<compile_context>
chip_gen: v5e
topology: v5e:2x2
jax: 0.10.0
libtpu: 0.0.40
codegen_flags: <defaults>
</compile_context>

<pallas_src>
import jax
import jax.numpy as jnp
from jax.experimental import pallas as pl
from jax.experimental.pallas import tpu as pltpu

_EPS = 1e-12  # matches torch.nn.functional.normalize default eps


def _cluster_lookup_kernel(alpha_ref, x_ref, cn_ref, probs_ref, loss_ref):
    """One grid step processes one (batch, pixel-tile) block.

    alpha_ref: (1,)        SMEM  softmax temperature
    x_ref:     (1, C, T)   VMEM  raw features (channels x pixels)
    cn_ref:    (N, C)      VMEM  pre-normalized cluster centers
    probs_ref: (1, N, T)   VMEM  output cluster probabilities (lane-dense)
    loss_ref:  (1,1,1,1)   VMEM  per-tile partial of -(probs * inner).sum()
    """
    x = x_ref[0].astype(jnp.float32)            # (C, T) raw features
    cn = cn_ref[...]                            # (N, C), already L2-normalized

    # MXU matmul on the RAW tile; the per-pixel 1/||x|| column scale factors
    # out of the dot product and is applied afterwards (no xn materialization).
    inner_raw = jax.lax.dot_general(
        cn, x,
        dimension_numbers=(((1,), (0,)), ((), ())),
        preferred_element_type=jnp.float32)                     # (N, T)

    sumsq = jnp.sum(x * x, axis=0, keepdims=True)               # (1, T)
    inv_norm = jax.lax.rsqrt(jnp.maximum(sumsq, _EPS * _EPS))   # 1/max(||x||, eps)
    inner = inner_raw * inv_norm                                # (N, T)

    # Softmax over clusters (axis 0).  |inner| <= 1 so scaled is bounded by
    # |alpha|; a constant shift replaces the XLU max-reduction safely.
    alpha = alpha_ref[0]
    e = jnp.exp(inner * alpha - jnp.abs(alpha))
    denom = jnp.sum(e, axis=0, keepdims=True)                   # (1, T)
    probs = e * pl.reciprocal(denom)                            # exact reciprocal

    probs_ref[0] = probs.astype(probs_ref.dtype)

    # Per-tile partial of the loss numerator; wrapper sums and divides by B*H*W.
    loss_ref[...] = jnp.reshape(-jnp.sum(probs * inner), (1, 1, 1, 1))


def _vmem_cap_bytes():
    """Usable scoped-VMEM cap: leave ~16 MiB headroom under physical VMEM."""
    try:
        phys = pltpu.get_tpu_info().vmem_capacity_bytes
    except Exception:
        phys = 64 << 20  # conservative default (v7x = 64 MiB physical)
    return int(min(max(phys - (16 << 20), 16 << 20), 96 << 20))


def _choose_tile(HW, B, tile_pixels):
    """Pick pixel-tile T.  Returns (T, HWp, grid_t).

    Prefers the largest multiple of 128 that divides HW (no padding, no
    padded-slice copy of probs); splits the pixel axis when the grid would
    otherwise collapse to a single step (v7x megacore balance); falls back to
    zero padding only when no lane-aligned divisor exists.
    """
    max_t = max(128, (min(tile_pixels, HW) // 128) * 128)
    divisors = [t for t in range(128, max_t + 1, 128) if HW % t == 0]
    if divisors:
        T = divisors[-1]
        if B * (HW // T) == 1 and len(divisors) > 1:
            # v7x has 2 TensorCores: make sure both get a grid step.
            T = next(t for t in reversed(divisors) if HW // t >= 2)
        return T, HW, HW // T
    if HW <= tile_pixels:
        # No lane-aligned divisor; a full-extent block is still legal.
        # TODO(synk): B==1 with one non-aligned tile leaves one v7x core idle.
        return HW, HW, 1
    # Fall back to zero padding: zero pixels give inner == 0 and contribute
    # exactly 0 to the loss sum; their probs are sliced off in the wrapper.
    T = max_t
    HWp = ((HW + T - 1) // T) * T
    return T, HWp, HWp // T


def cluster_lookup_forward(x_nchw, clusters, alpha, *, tile_pixels=2048):
    """x_nchw: [B, C, H, W]; clusters: [N, C]; alpha: float scalar.

    Returns (cluster_loss: f32 scalar, cluster_probs: [B, N, H, W] f32).
    """
    B, C, H, W = x_nchw.shape
    N, Cc = clusters.shape
    assert Cc == C
    HW = H * W
    P = B * HW

    # Pre-normalize the tiny (N, C) cluster matrix once (F.normalize semantics).
    c32 = clusters.astype(jnp.float32)
    c_sumsq = jnp.sum(c32 * c32, axis=1, keepdims=True)
    cn = c32 * jax.lax.rsqrt(jnp.maximum(c_sumsq, _EPS * _EPS))

    # [B, C, H, W] -> [B, C, HW] is a pure reshape (no transpose, no HBM copy).
    x3 = x_nchw.reshape(B, C, HW)

    # Tile selection + VMEM budget: shrink the tile if the real footprint
    # (double-buffered DMA tiles + live f32 intermediates) would exceed the cap.
    cap = _vmem_cap_bytes()
    tp = int(tile_pixels)
    while True:
        T, HWp, grid_t = _choose_tile(HW, B, tp)
        need = 4 * (2 * C * T + 2 * N * T + 2 * N * C   # double-buffered x/probs/cn
                    + C * T + 4 * N * T) + (2 << 20)    # in-kernel temporaries + slack
        if need <= cap or T <= 128:
            break
        tp = max(128, ((T // 2) // 128) * 128)
    vmem_limit_bytes = int(min(max(need, 16 << 20), cap))

    if HWp != HW:
        x3 = jnp.pad(x3, ((0, 0), (0, 0), (0, HWp - HW)))

    grid = (B, grid_t)
    alpha_arr = jnp.asarray([alpha], dtype=jnp.float32)

    probs3, loss_parts = pl.pallas_call(
        _cluster_lookup_kernel,
        out_shape=(
            jax.ShapeDtypeStruct((B, N, HWp), jnp.float32),
            jax.ShapeDtypeStruct((B, grid_t, 1, 1), jnp.float32),
        ),
        grid_spec=pltpu.PrefetchScalarGridSpec(
            num_scalar_prefetch=0,
            grid=grid,
            in_specs=[
                pl.BlockSpec(memory_space=pltpu.MemorySpace.SMEM),    # alpha
                pl.BlockSpec((1, C, T), lambda b, t: (b, 0, t)),      # x tile
                pl.BlockSpec((N, C), lambda b, t: (0, 0)),            # clusters (full)
            ],
            out_specs=(
                pl.BlockSpec((1, N, T), lambda b, t: (b, 0, t)),          # probs tile
                pl.BlockSpec((1, 1, 1, 1), lambda b, t: (b, t, 0, 0)),    # loss partial
            ),
        ),
        compiler_params=pltpu.CompilerParams(
            dimension_semantics=("parallel", "parallel"),
            vmem_limit_bytes=vmem_limit_bytes,
        ),
    )(alpha_arr, x3, cn)

    cluster_loss = jnp.sum(loss_parts) / jnp.float32(P)
    if HWp != HW:
        cluster_probs = probs3[:, :, :HW].reshape(B, N, H, W)
    else:
        cluster_probs = probs3.reshape(B, N, H, W)   # pure reshape, no copy
    return cluster_loss, cluster_probs


def _reference_forward(x_nchw, clusters, alpha):
    """Plain-JAX reference mirroring the PyTorch forward (softmax branch)."""
    cn = clusters / jnp.maximum(
        jnp.linalg.norm(clusters, axis=1, keepdims=True), _EPS)
    xn = x_nchw / jnp.maximum(
        jnp.linalg.norm(x_nchw, axis=1, keepdims=True), _EPS)
    inner = jnp.einsum('bchw,nc->bnhw', xn, cn)
    probs = jax.nn.softmax(inner * alpha, axis=1)
    loss = -(probs * inner).sum(1).mean()
    return loss, probs


if __name__ == "__main__":
    key = jax.random.PRNGKey(0)
    k_x, k_c = jax.random.split(key)

    B, C, H, W = 2, 4, 16, 16      # x: [batch, dim, height, width]
    n_classes = 8
    alpha = 3.0

    x = jax.random.normal(k_x, (B, C, H, W), dtype=jnp.float32)
    clusters = jax.random.normal(k_c, (n_classes, C), dtype=jnp.float32)

    loss, probs = cluster_lookup_forward(x, clusters, alpha)
    jax.block_until_ready((loss, probs))

    ref_loss, ref_probs = _reference_forward(x, clusters, alpha)
    assert jnp.allclose(loss, ref_loss, atol=1e-5, rtol=1e-5)
    assert jnp.allclose(probs, ref_probs, atol=1e-5, rtol=1e-5)

    print("KERNEL_OK")
</pallas_src>

<mosaic_0001>
module attributes {stable_mosaic.version = 11 : i64} {
  func.func @_cluster_lookup_kernel(%arg0: i32, %arg1: i32, %arg2: memref<1xf32, #tpu.memory_space<smem>>, %arg3: memref<1x4x256xf32, #tpu.memory_space<vmem>>, %arg4: memref<8x4xf32, #tpu.memory_space<vmem>>, %arg5: memref<1x8x256xf32, #tpu.memory_space<vmem>>, %arg6: memref<1x1x1x1xf32, #tpu.memory_space<vmem>>) attributes {dimension_semantics = [#tpu.dimension_semantics<parallel>, #tpu.dimension_semantics<parallel>], iteration_bounds = array<i64: 2, 1>, scalar_prefetch = 0 : i64, scratch_operands = 0 : i64, tpu.core_type = #tpu.core_type<tc>, window_params = [{transform_indices = @transform_0, window_bounds = array<i64: 1>}, {transform_indices = @transform_1, window_bounds = array<i64: 1, 4, 256>}, {pipeline_mode = #tpu.pipeline_mode<synchronous>, transform_indices = @transform_2, window_bounds = array<i64: 8, 4>}, {transform_indices = @transform_3, window_bounds = array<i64: 1, 8, 256>}, {transform_indices = @transform_4, window_bounds = array<i64: 1, 1, 1, 1>}]} {
    %c0 = arith.constant 0 : index
    %c0_0 = arith.constant 0 : index
    %c0_1 = arith.constant 0 : index
    %0 = vector.load %arg3[%c0, %c0_0, %c0_1] : memref<1x4x256xf32, #tpu.memory_space<vmem>>, vector<1x4x256xf32>
    %1 = vector.shape_cast %0 : vector<1x4x256xf32> to vector<4x256xf32>
    %c0_2 = arith.constant 0 : index
    %c0_3 = arith.constant 0 : index
    %2 = vector.load %arg4[%c0_2, %c0_3] : memref<8x4xf32, #tpu.memory_space<vmem>>, vector<8x4xf32>
    %cst = arith.constant dense<0.000000e+00> : vector<8x256xf32>
    %3 = tpu.matmul %2, %1, %cst {dimension_numbers = #tpu.dot_dimension_numbers<[1], [0], [0], [1], [0, 0, 1, 1], [], []>} : vector<8x4xf32>, vector<4x256xf32>, vector<8x256xf32> -> vector<8x256xf32>
    %4 = arith.mulf %1, %1 : vector<4x256xf32>
    %cst_4 = arith.constant dense<0.000000e+00> : vector<256xf32>
    %5 = vector.multi_reduction <add>, %4, %cst_4 [0] : vector<4x256xf32> to vector<256xf32>
    %6 = vector.shape_cast %5 : vector<256xf32> to vector<1x256xf32>
    %cst_5 = arith.constant 1.000000e-24 : f32
    %7 = vector.broadcast %cst_5 : f32 to vector<1x256xf32>
    %8 = arith.maximumf %6, %7 : vector<1x256xf32>
    %9 = math.rsqrt %8 : vector<1x256xf32>
    %10 = vector.broadcast %9 : vector<1x256xf32> to vector<8x256xf32>
    %11 = arith.mulf %3, %10 : vector<8x256xf32>
    %c0_6 = arith.constant 0 : index
    %12 = memref.load %arg2[%c0_6] : memref<1xf32, #tpu.memory_space<smem>>
    %13 = vector.broadcast %12 : f32 to vector<8x256xf32>
    %14 = arith.mulf %11, %13 : vector<8x256xf32>
    %15 = math.absf %12 : f32
    %16 = vector.broadcast %15 : f32 to vector<8x256xf32>
    %17 = arith.subf %14, %16 : vector<8x256xf32>
    %18 = math.exp %17 : vector<8x256xf32>
    %cst_7 = arith.constant dense<0.000000e+00> : vector<256xf32>
    %19 = vector.multi_reduction <add>, %18, %cst_7 [0] : vector<8x256xf32> to vector<256xf32>
    %20 = vector.shape_cast %19 : vector<256xf32> to vector<1x256xf32>
    %21 = tpu.reciprocal %20 : vector<1x256xf32> -> vector<1x256xf32>
    %22 = vector.broadcast %21 : vector<1x256xf32> to vector<8x256xf32>
    %23 = arith.mulf %18, %22 : vector<8x256xf32>
    %c0_8 = arith.constant 0 : index
    %c0_9 = arith.constant 0 : index
    %c0_10 = arith.constant 0 : index
    %24 = vector.load %arg5[%c0_8, %c0_9, %c0_10] : memref<1x8x256xf32, #tpu.memory_space<vmem>>, vector<1x8x256xf32>
    %25 = vector.shape_cast %24 : vector<1x8x256xf32> to vector<8x256xf32>
    %26 = vector.shape_cast %23 : vector<8x256xf32> to vector<1x8x256xf32>
    tpu.vector_store %arg5[%c0_8, %c0_9, %c0_10], %26 {strides = array<i32>} : memref<1x8x256xf32, #tpu.memory_space<vmem>>, vector<1x8x256xf32>,
    %27 = arith.mulf %23, %11 : vector<8x256xf32>
    %28 = vector.shape_cast %27 : vector<8x256xf32> to vector<1x8x256xf32>
    %cst_11 = arith.constant dense<0.000000e+00> : vector<1xf32>
    %29 = vector.multi_reduction <add>, %28, %cst_11 [1, 2] : vector<1x8x256xf32> to vector<1xf32>
    %30 = vector.shape_cast %29 : vector<1xf32> to vector<1x1x1xf32>
    %31 = vector.extract %30[0, 0, 0] : f32 from vector<1x1x1xf32>
    %cst_12 = arith.constant 0.000000e+00 : f32
    %32 = arith.subf %cst_12, %31 : f32
    %33 = vector.broadcast %32 : f32 to vector<1x1x1x1xf32>
    %c0_13 = arith.constant 0 : index
    %c0_14 = arith.constant 0 : index
    %c0_15 = arith.constant 0 : index
    %c0_16 = arith.constant 0 : index
    %34 = vector.load %arg6[%c0_13, %c0_14, %c0_15, %c0_16] : memref<1x1x1x1xf32, #tpu.memory_space<vmem>>, vector<1x1x1x1xf32>
    tpu.vector_store %arg6[%c0_13, %c0_14, %c0_15, %c0_16], %33 {strides = array<i32>} : memref<1x1x1x1xf32, #tpu.memory_space<vmem>>, vector<1x1x1x1xf32>,
    return
  }
  func.func @transform_0(%arg0: i32, %arg1: i32) -> i32 {
    %c0_i32 = arith.constant 0 : i32
    %c0_i32_0 = arith.constant 0 : i32
    return %c0_i32 : i32
  }
  func.func @transform_1(%arg0: i32, %arg1: i32) -> (i32, i32, i32) {
    %c0_i32 = arith.constant 0 : i32
    %c0_i32_0 = arith.constant 0 : i32
    return %arg0, %c0_i32, %arg1 : i32, i32, i32
  }
  func.func @transform_2(%arg0: i32, %arg1: i32) -> (i32, i32) {
    %c0_i32 = arith.constant 0 : i32
    %c0_i32_0 = arith.constant 0 : i32
    %c0_i32_1 = arith.constant 0 : i32
    return %c0_i32, %c0_i32_0 : i32, i32
  }
  func.func @transform_3(%arg0: i32, %arg1: i32) -> (i32, i32, i32) {
    %c0_i32 = arith.constant 0 : i32
    %c0_i32_0 = arith.constant 0 : i32
    return %arg0, %c0_i32, %arg1 : i32, i32, i32
  }
  func.func @transform_4(%arg0: i32, %arg1: i32) -> (i32, i32, i32, i32) {
    %c0_i32 = arith.constant 0 : i32
    %c0_i32_0 = arith.constant 0 : i32
    %c0_i32_1 = arith.constant 0 : i32
    return %arg0, %arg1, %c0_i32, %c0_i32_0 : i32, i32, i32, i32
  }
}

</mosaic_0001>

<bundles_post_ra>
// kernel: tpu_custom_call.1
= control target key start
LH: loop header
LB: loop body
LE: loop exit
PB: predicated region body
PF: predicated region fallthrough
CT: control target
= control target key end

     0   :  { %s932_s0 = inlined_call_operand.<no memory space> [shape: f32[1], index: 0, kind: input, shape index: {}]   ;;  %s933_s1 = inlined_call_operand.hbm [shape: f32[2,4,256], index: 1, kind: input, shape index: {}]   ;;  %s934_s2 = inlined_call_operand.vmem [shape: f32[8,4], index: 2, kind: input, shape index: {}]   ;;  %s935_s3 = inlined_call_operand.hbm [shape: f32[2,8,256], index: 3, kind: output, shape index: {0}]   ;;  %s936_s4 = inlined_call_operand.vmem [shape: f32[2,1,1,1], index: 4, kind: output, shape index: {1}]  }
   0x1   :  { %10 = sst [smem:[#allocation2]] %s932_s0 }
   0x2   :  { %11 = vsyncpa [#allocation4], 0 }
   0x3   :  { %13 = vsyncpa [#allocation4 + $0x1], 0 }
   0x4   :  { %14 = vsyncpa [#allocation5], 0 }
   0x5   :  { %16 = vsyncpa [#allocation5 + $0x1], 0  ;;  %s803_s17 = smov 0   ;;  %s805_s18 = smov 0  }
   0x6   :  { %s807_s19 = smov 0   ;;  %s809_s20 = smov 0  }
   0x7   :  { %s811_s21 = smov 0   ;;  %s813_s22 = smov 0  }
   0x8 LB: > { %s564_s0 = sadd.s32 4294967295, %s773_s22   ;;  %s565_s23 = sadd.s32 4294967294, %s773_s22   ;;  %s773_s22 = sphi %s813_s22, %s22_s22   ;;  %s769_s21 = sphi %s811_s21, %s945_s21   ;;  %s765_s20 = sphi %s809_s20, %s944_s20   ;;  %s761_s19 = sphi %s807_s19, %s943_s19   ;;  %s757_s18 = sphi %s805_s18, %s942_s18   ;;  %s753_s17 = sphi %s803_s17, %s941_s17  }
   0x9   : > { %s34_s24 = sadd.s32 1, %s769_s21  ;;  %s64_s25 = sadd.s32 1, %s761_s19 }
   0xa   : > { %p36_p0 = scmp.ge.s32.totalorder %s34_s24, 2  ;;  %p71_p1 = scmp.ne.s32.totalorder %s761_s19, %s757_s18 }
   0xb   : > { %p72_p2 = scmp.eq.s32.totalorder %s773_s22, 0  ;;  %p77_p3 = scmp.ne.s32.totalorder %s757_s18, %s753_s17 }
   0xc   : > { %s947_s24 = smov (%p36_p0, %s34_s24), 0  ;;  %p78_p5 = scmp.eq.s32.totalorder %s564_s0, 0 }
   0xd   : > { %p844_p4 = por %p72_p2, %p71_p1  ;;  %s59_s27 = ssub.s32 %s769_s21, %s947_s24 }
   0xe   : > { %p124_p6 = scmp.eq.s32.totalorder %s564_s0, 1  ;;  %p62_p7 = scmp.eq.s32.totalorder %s59_s27, 0 }
   0xf   : > { %p850_p8 = por %p78_p5, %p77_p3  ;;  %p130_p10 = scmp.eq.s32.totalorder %s565_s23, 1 }
  0x10   : > { %p854_p9 = por %p124_p6, %p71_p1  ;;  %p567_p12 = scmp.ge.s32.totalorder %s773_s22, 2 }
  0x11   : > { %s859_s30 = scalar_select %p62_p7, %s761_s19, %s64_s25  }
  0x12   : > { %p861_p11 = por %p130_p10, %p77_p3  ;;  %p599_p13 = scmp.lt.s32.totalorder %s773_s22, 2 }
  0x13   : > { %s184_s6 = sand.u32 1, %s761_s19   ;;  %s583_s8 = sshll.u32 %s769_s21, 3 }
  0x14   : > { %s568_s7 = sshll.u32 %s184_s6, 3  ;;  %s195_s11 = scalar_lea.hbm %s933_s1, %s583_s8 }
  0x15   : > { %s188_s12 = scalar_lea.vmem [#allocation3], %s568_s7  ;;  %s197_s14 = sshll.u32 %s195_s11, 4  ;;  %s198_s14 = int_to_ptr.hbm [resolvable:$true] %s197_s14 }
  0x16   : > { %s199_s13 = sshll.u32 %s188_s12, 4  ;;  %p592_p0 = pnand %p599_p13, %p844_p4  ;;  %s200_s13 = int_to_ptr.vmem [resolvable:$true] %s199_s13 }
  0x17   : > { %p571_p1 = scmp.ge.s32.totalorder %s773_s22, 1  ;;  %p204_p2 = scmp.lt.s32.totalorder %s773_s22, 3 }
  0x18   : > { %s185_s15 = scalar_lea.sflag [#allocation4], %s184_s6 }
  0x19   : > { %594 = dma.hbm_to_vmem [thread:$0]  (!%p592_p0), %s198_s14, 128, %s200_s13, %s185_s15  }
  0x1a   : > { %p205_p3 = pnand %p571_p1, %p204_p2 }
  0x1b   : > { %s877_s16 = sand.u32 (!%p205_p3), 1, %s757_s18  }
  0x1c   : > { %208 = sbr.rel (%p205_p3) target bundleno = 403 (0x193), region = 32  ;;  %s572_s0 = sshll.u32 (!%p205_p3), %s877_s16, 3 }
  0x1d   : > { %s211_s23 = scalar_lea.sflag (!%p205_p3), [#allocation4], %s877_s16  ;;  %s214_s25 = scalar_lea.vmem (!%p205_p3), [#allocation3], %s572_s0 }
  0x21   : > { %744 = dma.done.wait (%p850_p8), %s211_s23, 128  }
  0x22   : > { %746 = vsyncadd (%p850_p8), %s211_s23, 4294967168  ;;  %v254_v0 = vld [vmem:[%s214_s25] sm:$0xff]  ;;  %vm264_vm0 = vcmask 1043456   ;;  %v255_v2 = vld [vmem:[%s934_s2] sm:$0xff]  ;;  %vm260_vm1 = vcmask 31744   ;;  %s354_s28 = sld [smem:[#allocation2]] }
  0x23   : > { %257 = vst [vmem:[#allocation1] ss:$2 sm:$0xff] %v254_v0  ;;  %v309_v1 = vmul.f32 %v254_v0, %v254_v0  ;;  %s573_s7 = sshll.u32 %s877_s16, 4  ;;  %s584_s9 = sshll.u32 %s765_s20, 4 }
  0x24   : > { %s237_s8 = scalar_lea.vmem [#allocation6], %s573_s7  ;;  %s446_s12 = scalar_lea.hbm %s935_s3, %s584_s9 }
  0x25   : > { %s448_s13 = sshll.u32 %s237_s8, 4  ;;  %s450_s14 = sshll.u32 %s446_s12, 4  ;;  %s449_s13 = int_to_ptr.vmem [resolvable:$true] %s448_s13  ;;  %s451_s14 = int_to_ptr.hbm [resolvable:$true] %s450_s14 }
  0x26   : > { %s427_s15 = scalar_lea.sflag [#allocation5], %s877_s16  ;;  %s705_s0 = sshra.s32 %s451_s14, 4  ;;  %s706_s0 = int_to_ptr.hbm [resolvable:$true] %s705_s0 }
  0x27   : > { %s707_s23 = scalar_lea.hbm %s706_s0, 16  ;;  %s711_s27 = scalar_lea.hbm %s935_s3, 32 }
  0x28   : > { %s358_s6 = sand.u32 2147483647, %s354_s28  ;;  %v355_v38 = vstv %s354_s28  ;;  %p708_p4 = scmp.ne.s32.totalorder %s706_s0, %s707_s23 }
  0x29   : > { %v359_v42 = vstv %s358_s6  ;;  %p712_p7 = scmp.lt.s32.totalorder %s706_s0, %s935_s3  ;;  %p713_p8 = scmp.lt.s32.totalorder %s711_s27, %s707_s23 }
  0x2a   : > { %v258_v3 = vld.sshfl [vmem:[#allocation1] sm:$0xff pattern:$0x75316420]  ;;  %v259_v4 = vld.sshfl [vmem:[#allocation1 + $0x8] sm:$0xff pattern:$0x75316420]  ;;  %p709_p5 = pnand %p708_p4, %p854_p9 }
  0x2b   : > { %574 = vmatpush.msk.msra.mxu0 %vm264_vm0, %v258_v3  ;;  %576 = vmatpush.msk.msra.mxu1 %vm264_vm0, %v259_v4  ;;  %311 = vst [vmem:[#allocation1] ss:$2 sm:$0xff] %v309_v1  ;;  %p714_p10 = por %p713_p8, %p712_p7 }
  0x2c   : > { %575 = vmatmul.msk.f32.vlgmr.msra.gmra.mxu0 %vm260_vm1, %v255_v2  ;;  %577 = vmatmul.msk.f32.vlgmr.msra.gmra.mxu1 %vm260_vm1, %v255_v2  ;;  %p710_p6 = pneg %p709_p5 }
  0x2e   : > { %p715_p13 = pnand %p714_p10, %p710_p6 }
  0x32   : > { %v312_v5 = vld.sshfl [vmem:[#allocation1] sm:$0xff pattern:$0x75316420]  ;;  %v313_v6 = vld.sshfl [vmem:[#allocation1 + $0x8] sm:$0xff pattern:$0x75316420] }
  0x33   : > { %v316_v7 = vsel %vm264_vm0, %v312_v5, 0.0  ;;  %v323_v8 = vsel %vm264_vm0, %v313_v6, 0.0 }
  0x34   : > { %v317_v9 = vrot.slane %v316_v7, 4  ;;  %v324_v10 = vrot.slane %v323_v8, 4 }
  0x36   : > { %v318_v11 = vadd.f32 %v317_v9, %v316_v7  ;;  %v325_v12 = vadd.f32 %v324_v10, %v323_v8 }
  0x38   : > { %v319_v13 = vrot.slane %v318_v11, 2  ;;  %v326_v14 = vrot.slane %v325_v12, 2 }
  0x3a   : > { %v320_v15 = vadd.f32 %v319_v13, %v318_v11  ;;  %v327_v16 = vadd.f32 %v326_v14, %v325_v12 }
  0x3c   : > { %v321_v17 = vrot.slane %v320_v15, 1  ;;  %v328_v18 = vrot.slane %v327_v16, 1 }
  0x3e   : > { %v322_v19 = vadd.f32 %v321_v17, %v320_v15  ;;  %v329_v20 = vadd.f32 %v328_v18, %v327_v16 }
  0x40   : > { %v330_v21 = vmax.f32 %v322_v19, 1e-24  ;;  %v331_v22 = vmax.f32 %v329_v20, 1e-24 }
  0x42   : > { %649 = vrsqrt.f32 %v330_v21  ;;  %vm338_vm2 = vweird.f32 %v330_v21  ;;  %vm348_vm4 = vweird.f32 %v331_v22 }
  0x43   : > { %651 = vrsqrt.f32 %v331_v22 }
  0x48   : > { %v650_v23 = vpop.eup %649 }
  0x49   : > { %v652_v24 = vpop.eup %651  ;;  %v333_v25 = vmul.f32 %v650_v23, %v330_v21  ;;  %vm339_vm3 = vweird.f32 %v650_v23 }
  0x4a   : > { %v343_v26 = vmul.f32 %v652_v24, %v331_v22  ;;  %vm349_vm5 = vweird.f32 %v652_v24  ;;  %vm340_vm6 = vmor %vm338_vm2, %vm339_vm3 }
  0x4b   : > { %v334_v27 = vmul.f32 %v650_v23, %v333_v25  ;;  %vm350_vm7 = vmor %vm348_vm4, %vm349_vm5 }
  0x4c   : > { %v344_v28 = vmul.f32 %v652_v24, %v343_v26 }
  0x4d   : > { %v335_v29 = vmul.f32 0.5, %v334_v27 }
  0x4e   : > { %v345_v30 = vmul.f32 0.5, %v344_v28 }
  0x4f   : > { %v336_v31 = vsub.f32 1.5, %v335_v29 }
  0x50   : > { %v346_v32 = vsub.f32 1.5, %v345_v30 }
  0x51   : > { %v337_v33 = vmul.f32 %v650_v23, %v336_v31 }
  0x52   : > { %v347_v34 = vmul.f32 %v652_v24, %v346_v32 }
  0x53   : > { %v341_v35 = vsel %vm340_vm6, %v650_v23, %v337_v33 }
  0x54   : > { %v351_v36 = vsel %vm350_vm7, %v652_v24, %v347_v34 }
  0xa9   : > { %v286_v37 = vpop.f32.mrf.mxu0  ;;  %v306_v39 = vpop.f32.mrf.mxu1 }
  0xaa   : > { %v352_v40 = vmul.f32 %v341_v35, %v286_v37  ;;  %v353_v41 = vmul.f32 %v351_v36, %v306_v39 }
  0xac   : > { %v356_v43 = vmul.f32 %v355_v38, %v352_v40  ;;  %v357_v44 = vmul.f32 %v355_v38, %v353_v41 }
  0xae   : > { %v360_v45 = vsub.f32 %v356_v43, %v359_v42  ;;  %v361_v46 = vsub.f32 %v357_v44, %v359_v42 }
  0xb0   : > { %v362_v47 = vmul.f32 1.442695, %v360_v45  ;;  %v364_v48 = vmul.f32 1.442695, %v361_v46 }
  0xb2   : > { %653 = vpow2.f32 %v362_v47 }
  0xb3   : > { %655 = vpow2.f32 %v364_v48 }
  0xb8   : > { %v654_v49 = vpop.eup %653 }
  0xb9   : > { %v656_v50 = vpop.eup %655  ;;  %v366_v51 = vrot.slane %v654_v49, 4 }
  0xba   : > { %v372_v52 = vrot.slane %v656_v50, 4 }
  0xbb   : > { %v367_v53 = vadd.f32 %v654_v49, %v366_v51 }
  0xbc   : > { %v373_v54 = vadd.f32 %v656_v50, %v372_v52 }
  0xbd   : > { %v368_v55 = vrot.slane %v367_v53, 2 }
  0xbe   : > { %v374_v56 = vrot.slane %v373_v54, 2 }
  0xbf   : > { %v369_v57 = vadd.f32 %v368_v55, %v367_v53 }
  0xc0   : > { %v375_v58 = vadd.f32 %v374_v56, %v373_v54 }
  0xc1   : > { %v370_v59 = vrot.slane %v369_v57, 1 }
  0xc2   : > { %v376_v60 = vrot.slane %v375_v58, 1 }
  0xc3   : > { %v371_v61 = vadd.f32 %v370_v59, %v369_v57 }
  0xc4   : > { %v377_v62 = vadd.f32 %v376_v60, %v375_v58 }
  0xc5   : > { %657 = vrcp.f32 %v371_v61  ;;  %v389_v4 = vand.u32 2147483648, %v371_v61  ;;  %v387_v7 = vand.u32 2147483647, %v371_v61  ;;  %vm383_vm10 = vweird.f32 %v371_v61 }
  0xc6   : > { %659 = vrcp.f32 %v377_v62  ;;  %v403_v8 = vand.u32 2147483648, %v377_v62  ;;  %v401_v10 = vand.u32 2147483647, %v377_v62  ;;  %vm397_vm12 = vweird.f32 %v377_v62 }
  0xc7   : > { %v390_v12 = vor.u32 1.1754944e-38, %v389_v4  ;;  %vm388_vm13 = vcmp.eq.f32.partialorder %v387_v7, 8.507059e+37 }
  0xc8   : > { %v404_v15 = vor.u32 1.1754944e-38, %v403_v8  ;;  %vm402_vm15 = vcmp.eq.f32.partialorder %v401_v10, 8.507059e+37 }
  0xcb   : > { %v658_v63 = vpop.eup %657 }
  0xcc   : > { %v660_v0 = vpop.eup %659  ;;  %v379_v1 = vmul.f32 %v658_v63, %v371_v61  ;;  %vm384_vm8 = vweird.f32 %v658_v63 }
  0xcd   : > { %v393_v2 = vmul.f32 %v660_v0, %v377_v62  ;;  %vm398_vm9 = vweird.f32 %v660_v0  ;;  %vm385_vm11 = vmor %vm383_vm10, %vm384_vm8 }
  0xce   : > { %v380_v3 = vsub.f32 1.0, %v379_v1  ;;  %vm399_vm14 = vmor %vm397_vm12, %vm398_vm9 }
  0xcf   : > { %v394_v5 = vsub.f32 1.0, %v393_v2 }
  0xd0   : > { %v381_v6 = vmul.f32 %v658_v63, %v380_v3 }
  0xd1   : > { %v395_v9 = vmul.f32 %v660_v0, %v394_v5 }
  0xd2   : > { %v382_v11 = vadd.f32 %v658_v63, %v381_v6 }
  0xd3   : > { %v396_v13 = vadd.f32 %v660_v0, %v395_v9 }
  0xd4   : > { %v386_v14 = vsel %vm385_vm11, %v658_v63, %v382_v11 }
  0xd5   : > { %v391_v16 = vsel %vm388_vm13, %v390_v12, %v386_v14  ;;  %v400_v17 = vsel %vm399_vm14, %v660_v0, %v396_v13 }
  0xd6   : > { %v405_v18 = vsel %vm402_vm15, %v404_v15, %v400_v17  ;;  %v406_v19 = vmul.f32 %v654_v49, %v391_v16 }
  0xd7   : > { %v407_v20 = vmul.f32 %v656_v50, %v405_v18 }
  0xd8   : > { %v410_v21 = vmul.f32 %v406_v19, %v352_v40  ;;  %408 = vst [vmem:[%s237_s8] sm:$0xff] %v406_v19 }
  0xd9   : > { %v411_v22 = vmul.f32 %v407_v20, %v353_v41  ;;  %409 = vst [vmem:[%s237_s8 + $0x8] sm:$0xff] %v407_v20 }
  0xdb   : > { %v412_v23 = vadd.f32 %v411_v22, %v410_v21 }
  0xdd   : > { %413 = vadd.xlane.f32.xlu0 %v412_v23 }
  0xde   : > { %718 = shalt.err (!%p715_p13)
}
  0xdf   : > { %589 = dma.vmem_to_hbm [thread:$0]  (%p854_p9), %s449_s13, 256, %s451_s14, %s427_s15   ;;  %vm424_vm0 = vcmask 0  }
  0xe0   : > { %p248_p0 = scmp.lt.s32.totalorder %s765_s20, 1 }
  0xe2   : > { %s949_s20 = smov (!%p248_p0, %s765_s20), 1 }
  0xe3   : > { %s253_s9 = scalar_lea.vmem %s936_s4, %s949_s20 }
 0x150   : > { %v414_v24 = vpop.xlane.xlu0 %413 }
 0x151   : > { %v415_v25 = vrot.slane %v414_v24, 4 }
 0x153   : > { %v416_v26 = vadd.f32 %v415_v25, %v414_v24 }
 0x155   : > { %v417_v27 = vrot.slane %v416_v26, 2 }
 0x157   : > { %v418_v28 = vadd.f32 %v417_v27, %v416_v26 }
 0x159   : > { %v419_v29 = vrot.slane %v418_v28, 1 }
 0x15b   : > { %v420_v30 = vadd.f32 %v419_v29, %v418_v28 }
 0x15d   : > { %585 = vpush %v420_v30 }
 0x18e   : > { %s586_s16 = spop %585 }
 0x18f   : > { %s422_s10 = ssub.f32 0.0, %s586_s16 }
 0x191   : > { %v423_v31 = vstv %s422_s10 }
 0x192   : > { %425 = vst.msk [vmem:[%s253_s9] sm:$0x1] %vm424_vm0, %v423_v31 }
 0x193 PF: > { %s465_s29 = sand.u32 1, %s753_s17   ;;  %p596_p9 = pnand %p567_p12, %p861_p11 }
 0x194   : > { %s466_s11 = scalar_lea.sflag [#allocation5], %s465_s29 }
 0x195   : > { %p597_p1 = pneg %p596_p9 }
 0x197   : > { %748 = dma.done.wait (%p597_p1), %s466_s11, 256  }
 0x198   : > { %750 = vsyncadd (%p597_p1), %s466_s11, 4294967040  ;;  %s22_s22 = sadd.s32 1, %s773_s22   ;;  %s941_s17 = smov %s757_s18 }
 0x199   : > { %p19_p2 = scmp.ge.s32.totalorder %s22_s22, 4   ;;  %s942_s18 = smov %s761_s19 }
 0x19a   : > { %s943_s19 = smov %s859_s30  ;;  %s944_s20 = smov %s769_s21 }
 0x19b   : > { %s945_s21 = smov %s947_s24  ;;  %21 = sbr.rel (!%p19_p2) target bundleno = 8 (0x8), region = 89 }
 0x1a0   :  { %481 = vsyncpa [#allocation4], 1 }
 0x1a1   :  { %483 = vsyncpa [#allocation4 + $0x1], 1 }
 0x1a2   :  { %484 = vsyncpa [#allocation5], 1 }
 0x1a3   :  { %486 = vsyncpa [#allocation5 + $0x1], 1 }

</bundles_post_ra>
